<compile_context>
chip_gen: v6e
topology: v6e:2x2x1
jax: 0.10.0
libtpu: 0.0.40
codegen_flags: <defaults>
</compile_context>

<pallas_src>
import jax
import jax.numpy as jnp
from jax.experimental import pallas as pl
from jax.experimental.pallas import tpu as pltpu

HIDDEN = 64
_W3_ROWS = 8  # broadcast w3 to a full sublane group for the MXU M-dim


def _round_up(n, m):
    return ((n + m - 1) // m) * m


def critic_kernel(x_ref, w1_ref, b1_ref, w2_ref, b2_ref, w3r_ref, b3_ref, o_ref):
    wdt = w1_ref.dtype                        # matmul operand dtype (f32 or bf16)
    x = x_ref[...].astype(wdt)                # (TILE_B, F)

    # Layer 1: (TILE_B, F) @ (F, 64), f32 accumulation on the MXU.
    h1 = jnp.dot(x, w1_ref[...], preferred_element_type=jnp.float32)
    h1 = jnp.maximum(h1 + b1_ref[...].astype(jnp.float32), 0.0)

    # Layer 2: (TILE_B, 64) @ (64, 64).
    h2 = jnp.dot(h1.astype(wdt), w2_ref[...], preferred_element_type=jnp.float32)
    h2 = jnp.maximum(h2 + b2_ref[...].astype(jnp.float32), 0.0)      # (TILE_B, 64) f32

    # Layer 3, lane-dense: contract the hidden dim of the pre-broadcast w3 slab
    # (8, 64) with the hidden dim of h2 (TILE_B, 64) -> (8, TILE_B); batch ends
    # up on lanes so the (1, TILE_B) output store is a full 128-lane store.
    w3r = w3r_ref[...].astype(jnp.float32)
    v = jax.lax.dot_general(
        w3r, h2,
        dimension_numbers=(((1,), (1,)), ((), ())),
        preferred_element_type=jnp.float32)                          # (8, TILE_B)
    o_ref[...] = (v[0:1, :] + b3_ref[...].astype(jnp.float32)).astype(o_ref.dtype)


def critic_forward(x, params, *, tile_b=512, vmem_limit_bytes=32 * 1024 * 1024):
    """x: (B, feature_dim) -> (B, 1) float32 value estimates."""
    w1, b1, w2, b2, w3, b3 = params
    B, F = x.shape

    # Batch tile: multiple of 128 so the (1, TILE_B) output block is lane-dense.
    tb = min(int(tile_b), _round_up(B, 128))
    tb = _round_up(tb, 128)
    bp = _round_up(B, tb)
    if bp != B:
        x = jnp.pad(x, ((0, bp - B), (0, 0)))
    grid = (bp // tb,)

    # Host-side, one-time broadcast of w3 (1, 64) -> (8, 64) so the kernel body
    # does not re-broadcast on every grid step.
    w3_rows = jnp.broadcast_to(w3, (_W3_ROWS, HIDDEN))

    flops = 2 * bp * (F * HIDDEN + HIDDEN * HIDDEN + HIDDEN)
    bytes_accessed = (bp * F * x.dtype.itemsize + bp * 4
                      + sum(int(p.size) * p.dtype.itemsize for p in params))

    out = pl.pallas_call(
        critic_kernel,
        out_shape=jax.ShapeDtypeStruct((1, bp), jnp.float32),
        grid=grid,
        in_specs=[
            pl.BlockSpec((tb, F), lambda i: (i, 0)),             # x: tiled over batch
            pl.BlockSpec((F, HIDDEN), lambda i: (0, 0)),         # w1 (resident)
            pl.BlockSpec((1, HIDDEN), lambda i: (0, 0)),         # b1 (resident)
            pl.BlockSpec((HIDDEN, HIDDEN), lambda i: (0, 0)),    # w2 (resident)
            pl.BlockSpec((1, HIDDEN), lambda i: (0, 0)),         # b2 (resident)
            pl.BlockSpec((_W3_ROWS, HIDDEN), lambda i: (0, 0)),  # w3 rows (resident)
            pl.BlockSpec((1, 1), lambda i: (0, 0)),              # b3 (resident)
        ],
        out_specs=pl.BlockSpec((1, tb), lambda i: (0, i)),       # lane-dense output row
        compiler_params=pltpu.CompilerParams(
            dimension_semantics=("parallel",),
            vmem_limit_bytes=vmem_limit_bytes,
        ),
        cost_estimate=pl.CostEstimate(
            flops=flops, transcendentals=0, bytes_accessed=bytes_accessed),
    )(x, w1, b1, w2, b2, w3_rows, b3)

    # (1, Bp) lane-major slab -> (B, 1) like the PyTorch module.
    return out.reshape(bp, 1)[:B]


def init_params(key, feature_dim):
    """PyTorch-style U(-1/sqrt(fan_in), 1/sqrt(fan_in)) init.

    w1, w2 stored as (in_dim, out_dim) (transpose of PyTorch); w3 kept in
    PyTorch orientation (1, 64); biases as 2-D rows / (1, 1)."""
    ks = jax.random.split(key, 6)

    def uniform(k, shape, fan_in):
        bound = 1.0 / jnp.sqrt(float(fan_in))
        return jax.random.uniform(k, shape, jnp.float32, -bound, bound)

    w1 = uniform(ks[0], (feature_dim, HIDDEN), feature_dim)
    b1 = uniform(ks[1], (1, HIDDEN), feature_dim)
    w2 = uniform(ks[2], (HIDDEN, HIDDEN), HIDDEN)
    b2 = uniform(ks[3], (1, HIDDEN), HIDDEN)
    w3 = uniform(ks[4], (1, HIDDEN), HIDDEN)
    b3 = uniform(ks[5], (1, 1), HIDDEN)
    return (w1, b1, w2, b2, w3, b3)


def critic_ref(x, params):
    """Pure-JAX f32 reference of the same forward pass."""
    w1, b1, w2, b2, w3, b3 = (p.astype(jnp.float32) for p in params)
    xf = x.astype(jnp.float32)
    h1 = jnp.maximum(xf @ w1 + b1, 0.0)
    h2 = jnp.maximum(h1 @ w2 + b2, 0.0)
    return h2 @ w3.T + b3


if __name__ == "__main__":
    key = jax.random.PRNGKey(0)
    k_params, k_x1, k_x2 = jax.random.split(key, 3)

    feature_dim = 32
    params = init_params(k_params, feature_dim)

    # --- small f32 check (single grid step, batch padded to one 128-row tile) ---
    x = jax.random.normal(k_x1, (8, feature_dim), dtype=jnp.float32)
    out = jax.block_until_ready(critic_forward(x, params))
    ref = critic_ref(x, params)
    assert out.shape == (8, 1), out.shape
    assert jnp.allclose(out, ref, atol=1e-4, rtol=1e-4), "f32 mismatch vs reference"

    # --- multi-tile f32 check (B=300, tile_b=128 -> grid of 3 with padding) ---
    x2 = jax.random.normal(k_x2, (300, feature_dim), dtype=jnp.float32)
    out2 = jax.block_until_ready(critic_forward(x2, params, tile_b=128))
    ref2 = critic_ref(x2, params)
    assert out2.shape == (300, 1), out2.shape
    assert jnp.allclose(out2, ref2, atol=1e-4, rtol=1e-4), "tiled f32 mismatch"

    # --- bf16 operand path (v6e/v7x bandwidth optimization), loose tolerance ---
    params_bf16 = (params[0].astype(jnp.bfloat16), params[1],
                   params[2].astype(jnp.bfloat16), params[3],
                   params[4], params[5])
    out3 = jax.block_until_ready(
        critic_forward(x.astype(jnp.bfloat16), params_bf16))
    assert out3.shape == (8, 1), out3.shape
    assert jnp.allclose(out3, ref, atol=5e-2, rtol=5e-2), "bf16 mismatch vs f32 ref"

    print("KERNEL_OK")
</pallas_src>

<mosaic_0001>
module attributes {stable_mosaic.version = 11 : i64} {
  func.func @critic_kernel(%arg0: i32, %arg1: memref<128x32xf32, #tpu.memory_space<vmem>>, %arg2: memref<32x64xf32, #tpu.memory_space<vmem>>, %arg3: memref<1x64xf32, #tpu.memory_space<vmem>>, %arg4: memref<64x64xf32, #tpu.memory_space<vmem>>, %arg5: memref<1x64xf32, #tpu.memory_space<vmem>>, %arg6: memref<8x64xf32, #tpu.memory_space<vmem>>, %arg7: memref<1x1xf32, #tpu.memory_space<vmem>>, %arg8: memref<1x128xf32, #tpu.memory_space<vmem>>) attributes {dimension_semantics = [#tpu.dimension_semantics<parallel>], iteration_bounds = array<i64: 1>, scalar_prefetch = 0 : i64, scratch_operands = 0 : i64, tpu.core_type = #tpu.core_type<tc>, window_params = [{transform_indices = @transform_0, window_bounds = array<i64: 128, 32>}, {pipeline_mode = #tpu.pipeline_mode<synchronous>, transform_indices = @transform_1, window_bounds = array<i64: 32, 64>}, {pipeline_mode = #tpu.pipeline_mode<synchronous>, transform_indices = @transform_2, window_bounds = array<i64: 1, 64>}, {pipeline_mode = #tpu.pipeline_mode<synchronous>, transform_indices = @transform_3, window_bounds = array<i64: 64, 64>}, {pipeline_mode = #tpu.pipeline_mode<synchronous>, transform_indices = @transform_4, window_bounds = array<i64: 1, 64>}, {pipeline_mode = #tpu.pipeline_mode<synchronous>, transform_indices = @transform_5, window_bounds = array<i64: 8, 64>}, {pipeline_mode = #tpu.pipeline_mode<synchronous>, transform_indices = @transform_6, window_bounds = array<i64: 1, 1>}, {transform_indices = @transform_7, window_bounds = array<i64: 1, 128>}]} {
    %c0 = arith.constant 0 : index
    %c0_0 = arith.constant 0 : index
    %0 = vector.load %arg1[%c0, %c0_0] : memref<128x32xf32, #tpu.memory_space<vmem>>, vector<128x32xf32>
    %c0_1 = arith.constant 0 : index
    %c0_2 = arith.constant 0 : index
    %1 = vector.load %arg2[%c0_1, %c0_2] : memref<32x64xf32, #tpu.memory_space<vmem>>, vector<32x64xf32>
    %cst = arith.constant dense<0.000000e+00> : vector<128x64xf32>
    %2 = tpu.matmul %0, %1, %cst {dimension_numbers = #tpu.dot_dimension_numbers<[1], [0], [0], [1], [0, 0, 1, 1], [], []>} : vector<128x32xf32>, vector<32x64xf32>, vector<128x64xf32> -> vector<128x64xf32>
    %c0_3 = arith.constant 0 : index
    %c0_4 = arith.constant 0 : index
    %3 = vector.load %arg3[%c0_3, %c0_4] : memref<1x64xf32, #tpu.memory_space<vmem>>, vector<1x64xf32>
    %4 = vector.broadcast %3 : vector<1x64xf32> to vector<128x64xf32>
    %5 = arith.addf %2, %4 : vector<128x64xf32>
    %cst_5 = arith.constant 0.000000e+00 : f32
    %6 = vector.broadcast %cst_5 : f32 to vector<128x64xf32>
    %7 = arith.maximumf %5, %6 : vector<128x64xf32>
    %c0_6 = arith.constant 0 : index
    %c0_7 = arith.constant 0 : index
    %8 = vector.load %arg4[%c0_6, %c0_7] : memref<64x64xf32, #tpu.memory_space<vmem>>, vector<64x64xf32>
    %cst_8 = arith.constant dense<0.000000e+00> : vector<128x64xf32>
    %9 = tpu.matmul %7, %8, %cst_8 {dimension_numbers = #tpu.dot_dimension_numbers<[1], [0], [0], [1], [0, 0, 1, 1], [], []>} : vector<128x64xf32>, vector<64x64xf32>, vector<128x64xf32> -> vector<128x64xf32>
    %c0_9 = arith.constant 0 : index
    %c0_10 = arith.constant 0 : index
    %10 = vector.load %arg5[%c0_9, %c0_10] : memref<1x64xf32, #tpu.memory_space<vmem>>, vector<1x64xf32>
    %11 = vector.broadcast %10 : vector<1x64xf32> to vector<128x64xf32>
    %12 = arith.addf %9, %11 : vector<128x64xf32>
    %cst_11 = arith.constant 0.000000e+00 : f32
    %13 = vector.broadcast %cst_11 : f32 to vector<128x64xf32>
    %14 = arith.maximumf %12, %13 : vector<128x64xf32>
    %c0_12 = arith.constant 0 : index
    %c0_13 = arith.constant 0 : index
    %15 = vector.load %arg6[%c0_12, %c0_13] : memref<8x64xf32, #tpu.memory_space<vmem>>, vector<8x64xf32>
    %cst_14 = arith.constant dense<0.000000e+00> : vector<8x128xf32>
    %16 = tpu.matmul %15, %14, %cst_14 {dimension_numbers = #tpu.dot_dimension_numbers<[1], [1], [0], [0], [0, 0, 1, 0], [], []>} : vector<8x64xf32>, vector<128x64xf32>, vector<8x128xf32> -> vector<8x128xf32>
    %17 = vector.extract_strided_slice %16 {offsets = [0, 0], sizes = [1, 128], strides = [1, 1]} : vector<8x128xf32> to vector<1x128xf32>
    %c0_15 = arith.constant 0 : index
    %c0_16 = arith.constant 0 : index
    %18 = vector.load %arg7[%c0_15, %c0_16] : memref<1x1xf32, #tpu.memory_space<vmem>>, vector<1x1xf32>
    %19 = vector.broadcast %18 : vector<1x1xf32> to vector<1x128xf32>
    %20 = arith.addf %17, %19 : vector<1x128xf32>
    %c0_17 = arith.constant 0 : index
    %c0_18 = arith.constant 0 : index
    %21 = vector.load %arg8[%c0_17, %c0_18] : memref<1x128xf32, #tpu.memory_space<vmem>>, vector<1x128xf32>
    tpu.vector_store %arg8[%c0_17, %c0_18], %20 {strides = array<i32>} : memref<1x128xf32, #tpu.memory_space<vmem>>, vector<1x128xf32>,
    return
  }
  func.func @transform_0(%arg0: i32) -> (i32, i32) {
    %c0_i32 = arith.constant 0 : i32
    %c0_i32_0 = arith.constant 0 : i32
    return %arg0, %c0_i32 : i32, i32
  }
  func.func @transform_1(%arg0: i32) -> (i32, i32) {
    %c0_i32 = arith.constant 0 : i32
    %c0_i32_0 = arith.constant 0 : i32
    %c0_i32_1 = arith.constant 0 : i32
    return %c0_i32, %c0_i32_0 : i32, i32
  }
  func.func @transform_2(%arg0: i32) -> (i32, i32) {
    %c0_i32 = arith.constant 0 : i32
    %c0_i32_0 = arith.constant 0 : i32
    %c0_i32_1 = arith.constant 0 : i32
    return %c0_i32, %c0_i32_0 : i32, i32
  }
  func.func @transform_3(%arg0: i32) -> (i32, i32) {
    %c0_i32 = arith.constant 0 : i32
    %c0_i32_0 = arith.constant 0 : i32
    %c0_i32_1 = arith.constant 0 : i32
    return %c0_i32, %c0_i32_0 : i32, i32
  }
  func.func @transform_4(%arg0: i32) -> (i32, i32) {
    %c0_i32 = arith.constant 0 : i32
    %c0_i32_0 = arith.constant 0 : i32
    %c0_i32_1 = arith.constant 0 : i32
    return %c0_i32, %c0_i32_0 : i32, i32
  }
  func.func @transform_5(%arg0: i32) -> (i32, i32) {
    %c0_i32 = arith.constant 0 : i32
    %c0_i32_0 = arith.constant 0 : i32
    %c0_i32_1 = arith.constant 0 : i32
    return %c0_i32, %c0_i32_0 : i32, i32
  }
  func.func @transform_6(%arg0: i32) -> (i32, i32) {
    %c0_i32 = arith.constant 0 : i32
    %c0_i32_0 = arith.constant 0 : i32
    %c0_i32_1 = arith.constant 0 : i32
    return %c0_i32, %c0_i32_0 : i32, i32
  }
  func.func @transform_7(%arg0: i32) -> (i32, i32) {
    %c0_i32 = arith.constant 0 : i32
    %c0_i32_0 = arith.constant 0 : i32
    return %c0_i32, %arg0 : i32, i32
  }
}

</mosaic_0001>

<bundles_post_ra>
// kernel: tpu_custom_call.1
= control target key start
LH: loop header
LB: loop body
LE: loop exit
PB: predicated region body
PF: predicated region fallthrough
CT: control target
= control target key end

     0   :  { %s1103_s0 = inlined_call_operand.vmem [shape: f32[128,32], index: 0, kind: input, shape index: {}]   ;;  %s1104_s1 = inlined_call_operand.vmem [shape: f32[32,64], index: 1, kind: input, shape index: {}]   ;;  %s1105_s2 = inlined_call_operand.vmem [shape: f32[1,64], index: 2, kind: input, shape index: {}]   ;;  %s1106_s3 = inlined_call_operand.vmem [shape: f32[64,64], index: 3, kind: input, shape index: {}]   ;;  %s1107_s4 = inlined_call_operand.vmem [shape: f32[1,64], index: 4, kind: input, shape index: {}]   ;;  %s1108_s5 = inlined_call_operand.vmem [shape: f32[8,64], index: 5, kind: input, shape index: {}]   ;;  %s1109_s6 = inlined_call_operand.<no memory space> [shape: f32[1,1], index: 6, kind: input, shape index: {}]   ;;  %s1110_s7 = inlined_call_operand.hbm [shape: f32[1,128], index: 7, kind: output, shape index: {}]  }
   0x1   :  { %v12_v0 = vstv %s1109_s6 }
   0x2   :  { %13 = vst [vmem:[#allocation2] sm:$0x1] %v12_v0 }
   0x3   :  { %v48_v1 = vld [vmem:[%s1104_s1 + $0x18] sm:$0xff]  ;;  %v47_v2 = vld [vmem:[%s1104_s1 + $0x10] sm:$0xff]  ;;  %vm56_vm0 = vcmask 261120   ;;  %v29_v3 = vld [vmem:[%s1103_s0] sm:$0xff] }
   0x4   :  { %751 = vmatprep.subr.mxu1 %v48_v1  ;;  %v46_v4 = vld [vmem:[%s1104_s1 + $0x8] sm:$0xff]  ;;  %759 = vmatprep.mubr.msk.f32.mxu1 %vm56_vm0, %v29_v3  ;;  %v45_v5 = vld [vmem:[%s1104_s1] sm:$0xff]  ;;  %v273_v7 = vld [vmem:[%s1106_s3 + $0x38] sm:$0xff] }
   0x5   :  { %752 = vmatpush3.msra.mxu1 %v48_v1  ;;  %v30_v6 = vld [vmem:[%s1103_s0 + $0x8] sm:$0xff]  ;;  %v31_v8 = vld [vmem:[%s1103_s0 + $0x10] sm:$0xff] }
   0x6   :  { %753 = vmatprep.subr.mxu1 %v47_v2  ;;  %v272_v9 = vld [vmem:[%s1106_s3 + $0x30] sm:$0xff] }
   0x7   :  { %754 = vmatpush3.msra.mxu1 %v47_v2 }
   0x8   :  { %755 = vmatprep.subr.mxu1 %v46_v4 }
   0x9   :  { %756 = vmatpush3.msra.mxu1 %v46_v4 }
   0xa   :  { %757 = vmatprep.subr.mxu1 %v45_v5 }
   0xb   :  { %758 = vmatpush3.msra.mxu1 %v45_v5 }
   0xc   :  { %760 = vmatmul.mubr.msk.f32.vlgmr.msra.gmra.mxu1 %vm56_vm0, %v30_v6  ;;  %783 = vmatprep.subr.mxu1 %v273_v7 }
   0xd   :  { %14 = vsyncpa [#allocation4], 0  ;;  %762 = vmatprep.mubr.msk.f32.mxu1 %vm56_vm0, %v31_v8  ;;  %v32_v10 = vld [vmem:[%s1103_s0 + $0x18] sm:$0xff]  ;;  %784 = vmatpush3.msra.mxu1 %v273_v7  ;;  %v271_v11 = vld [vmem:[%s1106_s3 + $0x28] sm:$0xff]  ;;  %vm281_vm1 = vcmask 523264   ;;  %vm886_vm2 = vmmov 0  }
   0xe   :  { %v33_v12 = vld [vmem:[%s1103_s0 + $0x20] sm:$0xff]  ;;  %785 = vmatprep.subr.mxu1 %v272_v9  ;;  %v34_v14 = vld [vmem:[%s1103_s0 + $0x28] sm:$0xff]  ;;  %v269_v15 = vld [vmem:[%s1106_s3 + $0x18] sm:$0xff]  ;;  %s888_s6 = smov [#allocation3]  }
   0xf   :  { %786 = vmatpush3.msra.mxu1 %v272_v9  ;;  %v270_v13 = vld [vmem:[%s1106_s3 + $0x20] sm:$0xff]  ;;  %v35_v16 = vld [vmem:[%s1103_s0 + $0x30] sm:$0xff]  ;;  %v36_v18 = vld [vmem:[%s1103_s0 + $0x38] sm:$0xff]  ;;  %s631_s11 = sshll.u32 %s888_s6, 4  ;;  %s632_s11 = int_to_ptr.vmem [resolvable:$true] %s631_s11 }
  0x10   :  { %763 = vmatmul.mubr.msk.f32.gmra.mxu1 %vm56_vm0, %v32_v10  ;;  %787 = vmatprep.subr.mxu1 %v271_v11  ;;  %v268_v17 = vld [vmem:[%s1106_s3 + $0x10] sm:$0xff]  ;;  %v267_v19 = vld [vmem:[%s1106_s3 + $0x8] sm:$0xff]  ;;  %v37_v20 = vld [vmem:[%s1103_s0 + $0x40] sm:$0xff]  ;;  %s863_s12 = scalar_lea.vmem %s632_s11, 16  ;;  %s867_s13 = scalar_lea.vmem %s632_s11, 32 }
  0x11   :  { %765 = vmatprep.mubr.msk.f32.mxu1 %vm56_vm0, %v33_v12  ;;  %788 = vmatpush3.msra.mxu1 %v271_v11  ;;  %v38_v21 = vld [vmem:[%s1103_s0 + $0x48] sm:$0xff]  ;;  %v39_v22 = vld [vmem:[%s1103_s0 + $0x50] sm:$0xff]  ;;  %v40_v23 = vld [vmem:[%s1103_s0 + $0x58] sm:$0xff]  ;;  %p864_p0 = scmp.ne.s32.totalorder %s632_s11, %s863_s12  ;;  %p868_p1 = scmp.lt.s32.totalorder %s632_s11, %s632_s11 }
  0x12   :  { %789 = vmatprep.subr.mxu1 %v270_v13  ;;  %v41_v24 = vld [vmem:[%s1103_s0 + $0x60] sm:$0xff]  ;;  %v42_v25 = vld [vmem:[%s1103_s0 + $0x68] sm:$0xff]  ;;  %v43_v26 = vld [vmem:[%s1103_s0 + $0x70] sm:$0xff]  ;;  %p869_p2 = scmp.lt.s32.totalorder %s867_s13, %s863_s12 }
  0x13   :  { %790 = vmatpush3.msra.mxu1 %v270_v13  ;;  %v44_v27 = vld [vmem:[%s1103_s0 + $0x78] sm:$0xff]  ;;  %v266_v28 = vld [vmem:[%s1106_s3] sm:$0xff] }
  0x14   :  { %766 = vmatmul.mubr.msk.f32.gmra.mxu1 %vm56_vm0, %v34_v14  ;;  %791 = vmatprep.subr.mxu1 %v269_v15  ;;  %v639_v29 = vld [vmem:[%s1105_s2] ss:$0 sm:$0xff]  ;;  %v885_v14 = vmov 0.0   ;;  %p870_p3 = por %p869_p2, %p868_p1 }
  0x15   :  { %768 = vmatprep.mubr.msk.f32.mxu1 %vm56_vm0, %v35_v16  ;;  %792 = vmatpush3.msra.mxu1 %v269_v15  ;;  %v613_v15 = vld [vmem:[#allocation2] sm:$0x1]  ;;  %v887_v16 = vmov 0  }
  0x16   :  { %793 = vmatprep.subr.mxu1 %v268_v17  ;;  %823 = vmatprep.subr.mxu0 %v885_v14  ;;  %p871_p4 = pnand %p870_p3, %p864_p0 }
  0x17   :  { %794 = vmatpush3.msra.mxu1 %v268_v17  ;;  %855 = vmatprep.mubr.msk.f32.mxu0 %vm886_vm2, %v885_v14 }
  0x18   :  { %769 = vmatmul.mubr.msk.f32.gmra.mxu1 %vm56_vm0, %v36_v18  ;;  %795 = vmatprep.subr.mxu1 %v267_v19 }
  0x19   :  { %771 = vmatprep.mubr.msk.f32.mxu1 %vm56_vm0, %v37_v20  ;;  %796 = vmatpush3.msra.mxu1 %v267_v19 }
  0x1a   :  { %797 = vmatprep.subr.mxu1 %v266_v28  ;;  %862 = vset.pattern.permute.xlu0 %v887_v16 }
  0x1b   :  { %798 = vmatpush3.msra.mxu1 %v266_v28  ;;  %616 = vperm.xlu0 %862, %v613_v15  }
  0x1c   :  { %772 = vmatmul.mubr.msk.f32.gmra.mxu1 %vm56_vm0, %v38_v21 }
  0x1d   :  { %774 = vmatprep.mubr.msk.f32.mxu1 %vm56_vm0, %v39_v22 }
  0x20   :  { %775 = vmatmul.mubr.msk.f32.gmra.mxu1 %vm56_vm0, %v40_v23 }
  0x21   :  { %777 = vmatprep.mubr.msk.f32.mxu1 %vm56_vm0, %v41_v24 }
  0x24   :  { %778 = vmatmul.mubr.msk.f32.gmra.mxu1 %vm56_vm0, %v42_v25 }
  0x25   :  { %780 = vmatprep.mubr.msk.f32.mxu1 %vm56_vm0, %v43_v26 }
  0x28   :  { %781 = vmatmul.mubr.msk.f32.gmra.mxu1 %vm56_vm0, %v44_v27 }
  0xcc   :  { %v761_v30 = vpop.f32.mrf.mxu1 }
  0xcd   :  { %v177_v31 = vadd.f32 %v761_v30, %v639_v29 }
  0xce   :  { %v171_v32 = vpop.f32.mrf.mxu1 }
  0xcf   :  { %v172_v33 = vadd.f32 %v639_v29, %v171_v32  ;;  %v251_v36 = vmax.f32 %v177_v31, 0.0  ;;  %v656_v31 = vld [vmem:[%s1107_s4] ss:$0 sm:$0xff] }
  0xd0   :  { %v764_v34 = vpop.f32.mrf.mxu1 }
  0xd1   :  { %v250_v35 = vmax.f32 %v172_v33, 0.0  ;;  %v187_v37 = vadd.f32 %v764_v34, %v639_v29 }
  0xd2   :  { %v181_v38 = vpop.f32.mrf.mxu1 }
  0xd3   :  { %v182_v39 = vadd.f32 %v639_v29, %v181_v38  ;;  %799 = vmatprep.mubr.msk.f32.mxu1 %vm281_vm1, %v250_v35  ;;  %v253_v42 = vmax.f32 %v187_v37, 0.0 }
  0xd4   :  { %v767_v40 = vpop.f32.mrf.mxu1  ;;  %800 = vmatmul.mubr.msk.f32.vlgmr.msra.gmra.mxu1 %vm281_vm1, %v251_v36 }
  0xd5   :  { %v252_v41 = vmax.f32 %v182_v39, 0.0  ;;  %v197_v43 = vadd.f32 %v767_v40, %v639_v29 }
  0xd6   :  { %v191_v44 = vpop.f32.mrf.mxu1 }
  0xd7   :  { %v192_v45 = vadd.f32 %v639_v29, %v191_v44  ;;  %802 = vmatprep.mubr.msk.f32.mxu1 %vm281_vm1, %v252_v41  ;;  %v255_v48 = vmax.f32 %v197_v43, 0.0 }
  0xd8   :  { %v770_v46 = vpop.f32.mrf.mxu1  ;;  %803 = vmatmul.mubr.msk.f32.gmra.mxu1 %vm281_vm1, %v253_v42 }
  0xd9   :  { %v254_v47 = vmax.f32 %v192_v45, 0.0  ;;  %v207_v49 = vadd.f32 %v770_v46, %v639_v29 }
  0xda   :  { %v201_v50 = vpop.f32.mrf.mxu1 }
  0xdb   :  { %v202_v51 = vadd.f32 %v639_v29, %v201_v50  ;;  %805 = vmatprep.mubr.msk.f32.mxu1 %vm281_vm1, %v254_v47  ;;  %v257_v54 = vmax.f32 %v207_v49, 0.0 }
  0xdc   :  { %v773_v52 = vpop.f32.mrf.mxu1  ;;  %806 = vmatmul.mubr.msk.f32.gmra.mxu1 %vm281_vm1, %v255_v48 }
  0xdd   :  { %v256_v53 = vmax.f32 %v202_v51, 0.0  ;;  %v217_v55 = vadd.f32 %v773_v52, %v639_v29 }
  0xde   :  { %v211_v56 = vpop.f32.mrf.mxu1 }
  0xdf   :  { %v212_v57 = vadd.f32 %v639_v29, %v211_v56  ;;  %808 = vmatprep.mubr.msk.f32.mxu1 %vm281_vm1, %v256_v53  ;;  %v259_v60 = vmax.f32 %v217_v55, 0.0 }
  0xe0   :  { %v776_v58 = vpop.f32.mrf.mxu1  ;;  %809 = vmatmul.mubr.msk.f32.gmra.mxu1 %vm281_vm1, %v257_v54 }
  0xe1   :  { %v258_v59 = vmax.f32 %v212_v57, 0.0  ;;  %v227_v61 = vadd.f32 %v776_v58, %v639_v29 }
  0xe2   :  { %v221_v62 = vpop.f32.mrf.mxu1 }
  0xe3   :  { %v222_v63 = vadd.f32 %v639_v29, %v221_v62  ;;  %811 = vmatprep.mubr.msk.f32.mxu1 %vm281_vm1, %v258_v59  ;;  %v261_v2 = vmax.f32 %v227_v61, 0.0 }
  0xe4   :  { %v779_v0 = vpop.f32.mrf.mxu1  ;;  %812 = vmatmul.mubr.msk.f32.gmra.mxu1 %vm281_vm1, %v259_v60 }
  0xe5   :  { %v260_v1 = vmax.f32 %v222_v63, 0.0  ;;  %v237_v3 = vadd.f32 %v779_v0, %v639_v29 }
  0xe6   :  { %v231_v4 = vpop.f32.mrf.mxu1 }
  0xe7   :  { %v232_v5 = vadd.f32 %v639_v29, %v231_v4  ;;  %814 = vmatprep.mubr.msk.f32.mxu1 %vm281_vm1, %v260_v1  ;;  %v263_v8 = vmax.f32 %v237_v3, 0.0  ;;  %v619_v3 = vlaneseq }
  0xe8   :  { %v782_v6 = vpop.f32.mrf.mxu1  ;;  %815 = vmatmul.mubr.msk.f32.gmra.mxu1 %vm281_vm1, %v261_v2  ;;  %v491_v2 = vld [vmem:[%s1108_s5] sm:$0xff] }
  0xe9   :  { %v262_v7 = vmax.f32 %v232_v5, 0.0  ;;  %v247_v9 = vadd.f32 %v782_v6, %v639_v29  ;;  %v620_v4 = vshrl.u32 %v619_v3, 7  ;;  %v617_v6 = vpop.permute.xlu0 %616 }
  0xea   :  { %v241_v10 = vpop.f32.mrf.mxu1 }
  0xeb   :  { %v242_v11 = vadd.f32 %v639_v29, %v241_v10  ;;  %817 = vmatprep.mubr.msk.f32.mxu1 %vm281_vm1, %v262_v7  ;;  %v265_v13 = vmax.f32 %v247_v9, 0.0  ;;  %v621_v5 = vsub.s32 0, %v620_v4 }
  0xec   :  { %818 = vmatmul.mubr.msk.f32.gmra.mxu1 %vm281_vm1, %v263_v8 }
  0xed   :  { %v264_v12 = vmax.f32 %v242_v11, 0.0  ;;  %v622_v7 = vrot.slane %v617_v6, %v621_v5 }
  0xef   :  { %820 = vmatprep.mubr.msk.f32.mxu1 %vm281_vm1, %v264_v12 }
  0xf0   :  { %821 = vmatmul.mubr.msk.f32.gmra.mxu1 %vm281_vm1, %v265_v13 }
 0x194   :  { %v1053_v17 = vpop.f32.mrf.mxu1 }
 0x195   :  { %v402_v61 = vadd.f32 %v1053_v17, %v656_v31 }
 0x196   :  { %v1055_v18 = vpop.f32.mrf.mxu1 }
 0x197   :  { %v476_v63 = vmax.f32 %v402_v61, 0.0  ;;  %v397_v0 = vadd.f32 %v656_v31, %v1055_v18 }
 0x198   :  { %v804_v19 = vpop.f32.mrf.mxu1 }
 0x199   :  { %v412_v57 = vadd.f32 %v804_v19, %v656_v31  ;;  %v475_v1 = vmax.f32 %v397_v0, 0.0 }
 0x19a   :  { %v1057_v20 = vpop.f32.mrf.mxu1 }
 0x19b   :  { %v478_v59 = vmax.f32 %v412_v57, 0.0  ;;  %v407_v60 = vadd.f32 %v656_v31, %v1057_v20 }
 0x19c   :  { %v807_v21 = vpop.f32.mrf.mxu1 }
 0x19d   :  { %v422_v53 = vadd.f32 %v807_v21, %v656_v31  ;;  %v477_v62 = vmax.f32 %v407_v60, 0.0 }
 0x19e   :  { %v416_v22 = vpop.f32.mrf.mxu1 }
 0x19f   :  { %v480_v55 = vmax.f32 %v422_v53, 0.0  ;;  %v417_v56 = vadd.f32 %v656_v31, %v416_v22 }
 0x1a0   :  { %v810_v23 = vpop.f32.mrf.mxu1 }
 0x1a1   :  { %v432_v49 = vadd.f32 %v810_v23, %v656_v31  ;;  %v479_v58 = vmax.f32 %v417_v56, 0.0 }
 0x1a2   :  { %v426_v24 = vpop.f32.mrf.mxu1 }
 0x1a3   :  { %v482_v51 = vmax.f32 %v432_v49, 0.0  ;;  %v427_v52 = vadd.f32 %v656_v31, %v426_v24 }
 0x1a4   :  { %v813_v25 = vpop.f32.mrf.mxu1 }
 0x1a5   :  { %v442_v45 = vadd.f32 %v813_v25, %v656_v31  ;;  %v481_v54 = vmax.f32 %v427_v52, 0.0 }
 0x1a6   :  { %v436_v26 = vpop.f32.mrf.mxu1 }
 0x1a7   :  { %v484_v47 = vmax.f32 %v442_v45, 0.0  ;;  %v437_v48 = vadd.f32 %v656_v31, %v436_v26 }
 0x1a8   :  { %v816_v27 = vpop.f32.mrf.mxu1 }
 0x1a9   :  { %v452_v41 = vadd.f32 %v816_v27, %v656_v31  ;;  %v483_v50 = vmax.f32 %v437_v48, 0.0 }
 0x1aa   :  { %v446_v28 = vpop.f32.mrf.mxu1 }
 0x1ab   :  { %v486_v43 = vmax.f32 %v452_v41, 0.0  ;;  %v447_v44 = vadd.f32 %v656_v31, %v446_v28 }
 0x1ac   :  { %v819_v29 = vpop.f32.mrf.mxu1 }
 0x1ad   :  { %v462_v37 = vadd.f32 %v819_v29, %v656_v31  ;;  %v485_v46 = vmax.f32 %v447_v44, 0.0 }
 0x1ae   :  { %v456_v30 = vpop.f32.mrf.mxu1 }
 0x1af   :  { %v488_v39 = vmax.f32 %v462_v37, 0.0  ;;  %v457_v40 = vadd.f32 %v656_v31, %v456_v30 }
 0x1b0   :  { %v822_v32 = vpop.f32.mrf.mxu1 }
 0x1b1   :  { %v472_v33 = vadd.f32 %v822_v32, %v656_v31  ;;  %v487_v42 = vmax.f32 %v457_v40, 0.0 }
 0x1b2   :  { %v466_v34 = vpop.f32.mrf.mxu1 }
 0x1b3   :  { %v490_v35 = vmax.f32 %v472_v33, 0.0  ;;  %v467_v36 = vadd.f32 %v656_v31, %v466_v34 }
 0x1b5   :  { %824 = vmatpush3.xpose.msk.msra.mxu0 %vm281_vm1, %v490_v35  ;;  %v489_v38 = vmax.f32 %v467_v36, 0.0 }
 0x1b6   :  { %825 = vmatprep.subr.mxu0 %v885_v14 }
 0x1b9   :  { %826 = vmatpush3.xpose.msk.msra.mxu0 %vm281_vm1, %v489_v38 }
 0x1ba   :  { %827 = vmatprep.subr.mxu0 %v885_v14 }
 0x1bd   :  { %828 = vmatpush3.xpose.msk.msra.mxu0 %vm281_vm1, %v488_v39 }
 0x1be   :  { %829 = vmatprep.subr.mxu0 %v885_v14 }
 0x1c1   :  { %830 = vmatpush3.xpose.msk.msra.mxu0 %vm281_vm1, %v487_v42 }
 0x1c2   :  { %831 = vmatprep.subr.mxu0 %v885_v14 }
 0x1c5   :  { %832 = vmatpush3.xpose.msk.msra.mxu0 %vm281_vm1, %v486_v43 }
 0x1c6   :  { %833 = vmatprep.subr.mxu0 %v885_v14 }
 0x1c9   :  { %834 = vmatpush3.xpose.msk.msra.mxu0 %vm281_vm1, %v485_v46 }
 0x1ca   :  { %835 = vmatprep.subr.mxu0 %v885_v14 }
 0x1cd   :  { %836 = vmatpush3.xpose.msk.msra.mxu0 %vm281_vm1, %v484_v47 }
 0x1ce   :  { %837 = vmatprep.subr.mxu0 %v885_v14 }
 0x1d1   :  { %838 = vmatpush3.xpose.msk.msra.mxu0 %vm281_vm1, %v483_v50 }
 0x1d2   :  { %839 = vmatprep.subr.mxu0 %v885_v14 }
 0x1d5   :  { %840 = vmatpush3.xpose.msk.msra.mxu0 %vm281_vm1, %v482_v51 }
 0x1d6   :  { %841 = vmatprep.subr.mxu0 %v885_v14 }
 0x1d9   :  { %842 = vmatpush3.xpose.msk.msra.mxu0 %vm281_vm1, %v481_v54 }
 0x1da   :  { %843 = vmatprep.subr.mxu0 %v885_v14 }
 0x1dd   :  { %844 = vmatpush3.xpose.msk.msra.mxu0 %vm281_vm1, %v480_v55 }
 0x1de   :  { %845 = vmatprep.subr.mxu0 %v885_v14 }
 0x1e1   :  { %846 = vmatpush3.xpose.msk.msra.mxu0 %vm281_vm1, %v479_v58 }
 0x1e2   :  { %847 = vmatprep.subr.mxu0 %v885_v14 }
 0x1e5   :  { %848 = vmatpush3.xpose.msk.msra.mxu0 %vm281_vm1, %v478_v59 }
 0x1e6   :  { %849 = vmatprep.subr.mxu0 %v885_v14 }
 0x1e9   :  { %850 = vmatpush3.xpose.msk.msra.mxu0 %vm281_vm1, %v477_v62 }
 0x1ea   :  { %851 = vmatprep.subr.mxu0 %v885_v14 }
 0x1ed   :  { %852 = vmatpush3.xpose.msk.msra.mxu0 %vm281_vm1, %v476_v63 }
 0x1ee   :  { %853 = vmatprep.subr.mxu0 %v885_v14 }
 0x1f1   :  { %854 = vmatpush3.xpose.msk.msra.mxu0 %vm281_vm1, %v475_v1 }
 0x1f4   :  { %856 = vmatmul.mubr.msk.f32.vlgmr.msra.gmra.mxu0 %vm281_vm1, %v491_v2 }
 0x2b4   :  { %v609_v8 = vpop.f32.mrf.mxu0 }
 0x2b5   :  { %v623_v9 = vadd.f32 %v622_v7, %v609_v8 }
 0x2b6   :  { %v857_v10 = vpop.f32.mrf.mxu0 }
 0x2b7   :  { %624 = vst [vmem:[#allocation3] sm:$0x1] %v623_v9 }
 0x2b8   :  { %874 = shalt.err (!%p871_p4)
}
 0x2b9   :  { %634 = dma.vmem_to_hbm [thread:$0]  %s632_s11, 16, %s1110_s7, [#allocation4]  }
 0x2ba   :  { %883 = dma.done.wait [#allocation4], 16  }
 0x2bb   :  { %884 = vsyncadd [#allocation4], 4294967280 }
 0x2bc   :  { %638 = vsyncpa [#allocation4], 1 }

</bundles_post_ra>
